<compile_context>
chip_gen: v7x
topology: tpu7x:2x2x1
jax: 0.10.0
libtpu: 0.0.40
codegen_flags: <defaults>
</compile_context>

<pallas_src>
import functools

import jax
import jax.numpy as jnp
from jax.experimental import pallas as pl
from jax.experimental.pallas import tpu as pltpu


def _sdpa_dropout_kernel(x1_ref, x2_ref, x3_ref, u_ref, o_ref, *,
                         num_heads, drop_p):
    """One grid step = `Bblk` batch elements; all tiles resident in VMEM."""
    q = x1_ref[...]                                   # (Bblk, S, D)
    if num_heads != 1:
        # Fold the 1/num_heads score scale into q (far fewer VPU ops than
        # scaling the (S, T) score matrix).
        q = q * jnp.float32(1.0 / num_heads)
    k = x2_ref[...]                                   # (Bblk, T, D)

    # scores = q @ k^T, batched over Bblk, contracting the last dim of both
    # operands -> feeds the MXU directly, no explicit K-tile transpose.
    s = jax.lax.dot_general(
        q, k,
        dimension_numbers=(((2,), (2,)), ((0,), (0,))),
        preferred_element_type=jnp.float32)           # (Bblk, S, T)

    # numerically-stable softmax along the last axis
    m = jnp.max(s, axis=-1, keepdims=True)
    e = jnp.exp(s - m)
    probs = e * pl.reciprocal(jnp.sum(e, axis=-1, keepdims=True), approx=True)

    # dropout: keep where u >= drop_p, survivors scaled by 1/(1-drop_p)
    # (single select + single mul; correct for any drop_p).
    keep_scale = jnp.where(u_ref[...] >= drop_p,
                           jnp.float32(1.0 / (1.0 - drop_p)),
                           jnp.float32(0.0))
    y4 = probs * keep_scale                           # (Bblk, S, T)

    # out = y4 @ x3 : x3 is shared across the batch, so flatten (Bblk, S) into
    # the MXU row dimension -> one (Bblk*S, T) x (T, E) matmul.  With S=8 and
    # T, E multiples of 128 the reshapes don't cross (8,128) tile boundaries.
    bblk, ss, tt = y4.shape
    ee = x3_ref.shape[-1]
    out = jnp.dot(y4.reshape(bblk * ss, tt).astype(x3_ref.dtype),
                  x3_ref[...],
                  preferred_element_type=jnp.float32)  # (Bblk*S, E)
    o_ref[...] = out.reshape(bblk, ss, ee).astype(o_ref.dtype)


def model_forward(x1, x2, x3, *, dropout_rng, num_heads=1, drop_p=0.5,
                  batch_block=None):
    B, S, D = x1.shape
    Bk, T, Dk = x2.shape
    Tv, E = x3.shape
    assert B == Bk and D == Dk and T == Tv, "inconsistent input shapes"

    if batch_block is None:
        batch_block = B
    assert B % batch_block == 0, "batch must divide evenly into batch blocks"
    grid = (B // batch_block,)

    # Dropout randomness from the standard JAX RNG (the TPU hardware-PRNG
    # primitives are TPU-only); the mask/scale application stays in-kernel.
    u = jax.random.uniform(dropout_rng, (B, S, T), dtype=jnp.float32)

    kernel = functools.partial(_sdpa_dropout_kernel,
                               num_heads=num_heads, drop_p=drop_p)

    return pl.pallas_call(
        kernel,
        out_shape=jax.ShapeDtypeStruct((B, S, E), x1.dtype),
        grid=grid,
        in_specs=[
            pl.BlockSpec((batch_block, S, D), lambda b: (b, 0, 0)),   # x1
            pl.BlockSpec((batch_block, T, D), lambda b: (b, 0, 0)),   # x2
            pl.BlockSpec((T, E), lambda b: (0, 0)),                   # x3 (grid-invariant)
            pl.BlockSpec((batch_block, S, T), lambda b: (b, 0, 0)),   # dropout uniforms
        ],
        out_specs=pl.BlockSpec((batch_block, S, E), lambda b: (b, 0, 0)),
        compiler_params=pltpu.CompilerParams(
            dimension_semantics=("parallel",)),   # batch blocks are independent
    )(x1, x2, x3, u)


if __name__ == "__main__":
    # Small, consistent, tile-friendly shapes: B batches, S queries,
    # T keys/values, D q/k feature dim, E output feature dim.
    B, S, T, D, E = 4, 8, 128, 128, 128

    key = jax.random.PRNGKey(0)
    k1, k2, k3, k4 = jax.random.split(key, 4)
    x1 = jax.random.normal(k1, (B, S, D), dtype=jnp.float32)
    x2 = jax.random.normal(k2, (B, T, D), dtype=jnp.float32)
    x3 = jax.random.normal(k3, (T, E), dtype=jnp.float32)

    out = model_forward(x1, x2, x3, dropout_rng=k4,
                        num_heads=1, drop_p=0.5, batch_block=2)
    jax.block_until_ready(out)
    assert out.shape == (B, S, E)
    print("KERNEL_OK")
</pallas_src>

<mosaic_0001>
module attributes {stable_mosaic.version = 11 : i64} {
  func.func @_sdpa_dropout_kernel(%arg0: i32, %arg1: memref<2x8x128xf32, #tpu.memory_space<vmem>>, %arg2: memref<2x128x128xf32, #tpu.memory_space<vmem>>, %arg3: memref<128x128xf32, #tpu.memory_space<vmem>>, %arg4: memref<2x8x128xf32, #tpu.memory_space<vmem>>, %arg5: memref<2x8x128xf32, #tpu.memory_space<vmem>>) attributes {dimension_semantics = [#tpu.dimension_semantics<parallel>], iteration_bounds = array<i64: 2>, scalar_prefetch = 0 : i64, scratch_operands = 0 : i64, tpu.core_type = #tpu.core_type<tc>, window_params = [{transform_indices = @transform_0, window_bounds = array<i64: 2, 8, 128>}, {transform_indices = @transform_1, window_bounds = array<i64: 2, 128, 128>}, {pipeline_mode = #tpu.pipeline_mode<synchronous>, transform_indices = @transform_2, window_bounds = array<i64: 128, 128>}, {transform_indices = @transform_3, window_bounds = array<i64: 2, 8, 128>}, {transform_indices = @transform_4, window_bounds = array<i64: 2, 8, 128>}]} {
    %c0 = arith.constant 0 : index
    %c0_0 = arith.constant 0 : index
    %c0_1 = arith.constant 0 : index
    %0 = vector.load %arg1[%c0, %c0_0, %c0_1] : memref<2x8x128xf32, #tpu.memory_space<vmem>>, vector<2x8x128xf32>
    %c0_2 = arith.constant 0 : index
    %c0_3 = arith.constant 0 : index
    %c0_4 = arith.constant 0 : index
    %1 = vector.load %arg2[%c0_2, %c0_3, %c0_4] : memref<2x128x128xf32, #tpu.memory_space<vmem>>, vector<2x128x128xf32>
    %cst = arith.constant dense<0.000000e+00> : vector<2x8x128xf32>
    %2 = tpu.matmul %0, %1, %cst {dimension_numbers = #tpu.dot_dimension_numbers<[2], [2], [1], [1], [0, 0, 0, 1, 1, 1], [0], [0]>} : vector<2x8x128xf32>, vector<2x128x128xf32>, vector<2x8x128xf32> -> vector<2x8x128xf32>
    %cst_5 = arith.constant dense<0xFF800000> : vector<2x8xf32>
    %3 = vector.multi_reduction <maximumf>, %2, %cst_5 [2] : vector<2x8x128xf32> to vector<2x8xf32>
    %4 = vector.shape_cast %3 : vector<2x8xf32> to vector<2x8x1xf32>
    %5 = vector.broadcast %4 : vector<2x8x1xf32> to vector<2x8x128xf32>
    %6 = arith.subf %2, %5 : vector<2x8x128xf32>
    %7 = math.exp %6 : vector<2x8x128xf32>
    %cst_6 = arith.constant dense<0.000000e+00> : vector<2x8xf32>
    %8 = vector.multi_reduction <add>, %7, %cst_6 [2] : vector<2x8x128xf32> to vector<2x8xf32>
    %9 = vector.shape_cast %8 : vector<2x8xf32> to vector<2x8x1xf32>
    %10 = tpu.reciprocal %9 {approx = true} : vector<2x8x1xf32> -> vector<2x8x1xf32>
    %11 = vector.broadcast %10 : vector<2x8x1xf32> to vector<2x8x128xf32>
    %12 = arith.mulf %7, %11 : vector<2x8x128xf32>
    %c0_7 = arith.constant 0 : index
    %c0_8 = arith.constant 0 : index
    %c0_9 = arith.constant 0 : index
    %13 = vector.load %arg4[%c0_7, %c0_8, %c0_9] : memref<2x8x128xf32, #tpu.memory_space<vmem>>, vector<2x8x128xf32>
    %cst_10 = arith.constant 5.000000e-01 : f32
    %14 = vector.broadcast %cst_10 : f32 to vector<2x8x128xf32>
    %15 = arith.cmpf oge, %13, %14 : vector<2x8x128xf32>
    %cst_11 = arith.constant 2.000000e+00 : f32
    %cst_12 = arith.constant 0.000000e+00 : f32
    %16 = vector.broadcast %cst_11 : f32 to vector<2x8x128xf32>
    %17 = vector.broadcast %cst_12 : f32 to vector<2x8x128xf32>
    %18 = arith.select %15, %16, %17 : vector<2x8x128xi1>, vector<2x8x128xf32>
    %19 = arith.mulf %12, %18 : vector<2x8x128xf32>
    %20 = vector.shape_cast %19 : vector<2x8x128xf32> to vector<16x128xf32>
    %c0_13 = arith.constant 0 : index
    %c0_14 = arith.constant 0 : index
    %21 = vector.load %arg3[%c0_13, %c0_14] : memref<128x128xf32, #tpu.memory_space<vmem>>, vector<128x128xf32>
    %cst_15 = arith.constant dense<0.000000e+00> : vector<16x128xf32>
    %22 = tpu.matmul %20, %21, %cst_15 {dimension_numbers = #tpu.dot_dimension_numbers<[1], [0], [0], [1], [0, 0, 1, 1], [], []>} : vector<16x128xf32>, vector<128x128xf32>, vector<16x128xf32> -> vector<16x128xf32>
    %23 = vector.shape_cast %22 : vector<16x128xf32> to vector<2x8x128xf32>
    %c0_16 = arith.constant 0 : index
    %c0_17 = arith.constant 0 : index
    %c0_18 = arith.constant 0 : index
    %24 = vector.load %arg5[%c0_16, %c0_17, %c0_18] : memref<2x8x128xf32, #tpu.memory_space<vmem>>, vector<2x8x128xf32>
    tpu.vector_store %arg5[%c0_16, %c0_17, %c0_18], %23 {strides = array<i32>} : memref<2x8x128xf32, #tpu.memory_space<vmem>>, vector<2x8x128xf32>,
    return
  }
  func.func @transform_0(%arg0: i32) -> (i32, i32, i32) {
    %c0_i32 = arith.constant 0 : i32
    %c0_i32_0 = arith.constant 0 : i32
    %c0_i32_1 = arith.constant 0 : i32
    return %arg0, %c0_i32, %c0_i32_0 : i32, i32, i32
  }
  func.func @transform_1(%arg0: i32) -> (i32, i32, i32) {
    %c0_i32 = arith.constant 0 : i32
    %c0_i32_0 = arith.constant 0 : i32
    %c0_i32_1 = arith.constant 0 : i32
    return %arg0, %c0_i32, %c0_i32_0 : i32, i32, i32
  }
  func.func @transform_2(%arg0: i32) -> (i32, i32) {
    %c0_i32 = arith.constant 0 : i32
    %c0_i32_0 = arith.constant 0 : i32
    %c0_i32_1 = arith.constant 0 : i32
    return %c0_i32, %c0_i32_0 : i32, i32
  }
  func.func @transform_3(%arg0: i32) -> (i32, i32, i32) {
    %c0_i32 = arith.constant 0 : i32
    %c0_i32_0 = arith.constant 0 : i32
    %c0_i32_1 = arith.constant 0 : i32
    return %arg0, %c0_i32, %c0_i32_0 : i32, i32, i32
  }
  func.func @transform_4(%arg0: i32) -> (i32, i32, i32) {
    %c0_i32 = arith.constant 0 : i32
    %c0_i32_0 = arith.constant 0 : i32
    %c0_i32_1 = arith.constant 0 : i32
    return %arg0, %c0_i32, %c0_i32_0 : i32, i32, i32
  }
}

</mosaic_0001>

<bundles_post_ra>
// kernel: tpu_custom_call.1
= control target key start
LH: loop header
LB: loop body
LE: loop exit
PB: predicated region body
PF: predicated region fallthrough
CT: control target
= control target key end

     0   :  { %s1704_s0 = inlined_call_operand.hbm [shape: f32[4,8,128], index: 0, kind: input, shape index: {}]   ;;  %s1705_s1 = inlined_call_operand.hbm [shape: f32[4,128,128], index: 1, kind: input, shape index: {}]   ;;  %s1706_s2 = inlined_call_operand.hbm [shape: f32[128,128], index: 2, kind: input, shape index: {}]   ;;  %s1707_s3 = inlined_call_operand.hbm [shape: f32[4,8,128], index: 3, kind: input, shape index: {}]   ;;  %s1708_s4 = inlined_call_operand.hbm [shape: f32[4,8,128], index: 4, kind: output, shape index: {}]  }
   0x1   :  { %1715 = sst [smem:[#allocation17_spill]] %s1704_s0 }
   0x2   :  { %1716 = sst [smem:[#allocation18_spill]] %s1706_s2 }
   0x3   :  { %9 = vsyncpa [#allocation3], 0 }
   0x4   :  { %11 = vsyncpa [#allocation3 + $0x1], 0 }
   0x5   :  { %12 = vsyncpa [#allocation6], 0 }
   0x6   :  { %14 = vsyncpa [#allocation6 + $0x1], 0 }
   0x7   :  { %15 = vsyncpa [#allocation9], 0 }
   0x8   :  { %17 = vsyncpa [#allocation9 + $0x1], 0 }
   0x9   :  { %18 = vsyncpa [#allocation4], 0 }
   0xa   :  { %20 = vsyncpa [#allocation4 + $0x1], 0  ;;  %s1334_s15 = smov 0   ;;  %s1336_s16 = smov 0  }
   0xb   :  { %s1338_s17 = smov 0   ;;  %s1340_s18 = smov 0  }
   0xc LB: > { %s1355_s19 = sadd.s32 4294967295, %s1295_s18   ;;  %s750_s20 = sadd.s32 4294967294, %s1295_s18   ;;  %s1295_s18 = sphi %s1340_s18, %s1744_s18   ;;  %s1291_s17 = sphi %s1338_s17, %s1743_s17   ;;  %s1287_s16 = sphi %s1336_s16, %s1742_s16   ;;  %s1283_s15 = sphi %s1334_s15, %s1741_s15  }
   0xd   : > { %s1359_s21 = sadd.s32 1, %s1295_s18   ;;  %s33_s22 = sadd.s32 1, %s1291_s17 }
   0xe   : > { %s30_s23 = ssub.s32 %s1295_s18, %s1359_s21  ;;  %p40_p0 = scmp.ne.s32.totalorder %s1291_s17, %s1287_s16 }
   0xf   : > { %p31_p1 = scmp.eq.s32.totalorder %s30_s23, 0  ;;  %p41_p2 = scmp.eq.s32.totalorder %s1295_s18, 0 }
  0x10   : > { %p46_p3 = scmp.ne.s32.totalorder %s1287_s16, %s1283_s15  ;;  %p1709_p4 = scmp.eq.s32.totalorder %s1355_s19, 0 }
  0x11   : > { %s1371_s24 = scalar_select %p31_p1, %s1291_s17, %s33_s22  }
  0x12   : > { %p1373_p5 = por %p41_p2, %p40_p0  ;;  %p1379_p6 = por %p1709_p4, %p46_p3 }
  0x13   : > { %1717 = sst [smem:[#allocation16_spill]] %s1371_s24  ;;  %p143_p7 = scmp.eq.s32.totalorder %s1355_s19, 1 }
  0x14   : > { %s1718_s25 = scalar_select %p1373_p5, 1, 0 }
  0x15   : > { %s1719_s26 = scalar_select %p1379_p6, 1, 0 }
  0x16   : > { %p149_p8 = scmp.eq.s32.totalorder %s750_s20, 1  ;;  %p751_p9 = scmp.ge.s32.totalorder %s1295_s18, 1 }
  0x17   : > { %p156_p10 = scmp.lt.s32.totalorder %s1295_s18, 3  ;;  %p1386_p11 = por %p143_p7, %p40_p0 }
  0x18   : > { %p1390_p12 = por %p149_p8, %p46_p3  ;;  %s1297_s30 = smov [#allocation7]  }
  0x19   : > { %s1720_s27 = scalar_select %p1386_p11, 1, 0 }
  0x1a   : > { %s1721_s28 = scalar_select %p1390_p12, 1, 0 }
  0x1b   : > { %p1394_p13 = pnand %p751_p9, %p156_p10  ;;  %s168_s5 = sshll.u32 %s1297_s30, 4  ;;  %s169_s5 = int_to_ptr.vmem [resolvable:$true] %s168_s5 }
  0x1c   : > { %s1409_s7 = sand.u32 1, %s1291_s17   ;;  %s1724_s2 = sld [smem:[#allocation18_spill]] }
  0x1d   : > { %s1722_s29 = scalar_select %p1394_p13, 1, 0 }
  0x1e   : > { %p1029_p1 = pneg %p1394_p13 }
  0x20   : > { %p1402_p2 = pnand %p1029_p1, %p1709_p4 }
  0x22   : > { %s1099_s10 = scalar_lea.hbm %s1724_s2, 2048  ;;  %p1101_p8 = pneg %p1402_p2 }
  0x23   : > { %p1100_p7 = scmp.ne.s32.totalorder %s1724_s2, %s1099_s10  ;;  %p1106_p1 = scmp.lt.u32.totalorder %s1099_s10, %s1724_s2 }
  0x25   : > { %p1102_p9 = pnand %p1101_p8, %p1100_p7 }
  0x27   : > { %p1103_p10 = pneg %p1102_p9 }
  0x29   : > { %p1108_p0 = pnand %p1106_p1, %p1103_p10 }
  0x2b   : > { %1111 = shalt.err (!%p1108_p0)
}
  0x2c   : > { %s1112_s20 = scalar_lea.vmem %s169_s5, 2048  ;;  %p1120_p11 = scmp.lt.s32.totalorder %s169_s5, %s169_s5 }
  0x2d   : > { %p1113_p4 = scmp.ne.s32.totalorder %s169_s5, %s1112_s20  ;;  %p1121_p6 = scmp.lt.s32.totalorder %s1112_s20, %s1112_s20 }
  0x2f   : > { %p1115_p3 = pnand %p1113_p4, %p1101_p8  ;;  %p1122_p13 = por %p1121_p6, %p1120_p11 }
  0x31   : > { %p1116_p12 = pneg %p1115_p3 }
  0x33   : > { %p1123_p5 = pnand %p1122_p13, %p1116_p12 }
  0x35   : > { %1126 = shalt.err (!%p1123_p5)
}
  0x36   : > { %s1298_s22 = smov 128   ;;  %s1299_s23 = smov 8  }
  0x37   : > { %1032 = dma.hbm_to_vmem [thread:$0]  (!%p1402_p2), %s1724_s2, 2048, %s169_s5, [#allocation6], %s1298_s22, %s1298_s22, %s1299_s23  }
  0x38   : > { %s1713_s9 = sshll.u32 %s1409_s7, 4  ;;  %s1714_s10 = sshll.u32 %s1295_s18, 8 }
  0x39   : > { %s1725_s0 = sld [smem:[#allocation17_spill]]  ;;  %s186_s6 = scalar_lea.vmem [#allocation2], %s1713_s9 }
  0x3a   : > { %s193_s14 = sshll.u32 %s186_s6, 4  ;;  %p1726_p4 = scmp.ne.s32.totalorder %s1718_s25, 0  ;;  %s1449_s14 = int_to_ptr.vmem [resolvable:$true] %s193_s14 }
  0x3b   : > { %p1727_p5 = scmp.lt.s32.totalorder %s1295_s18, 2  ;;  %s183_s30 = scalar_lea.sflag [#allocation3], %s1409_s7 }
  0x3d   : > { %p1445_p6 = pnand %p1727_p5, %p1726_p4 }
  0x3f   : > { %s1437_s13 = scalar_lea.hbm %s1725_s0, %s1714_s10  ;;  %p1457_p12 = pneg %p1445_p6 }
  0x40   : > { %s1127_s8 = scalar_lea.hbm %s1437_s13, 256  ;;  %s1132_s6 = scalar_lea.hbm %s1725_s0, 512 }
  0x41   : > { %p1128_p11 = scmp.ne.s32.totalorder %s1437_s13, %s1127_s8  ;;  %p1133_p0 = scmp.lt.u32.totalorder %s1437_s13, %s1725_s0 }
  0x42   : > { %p1134_p3 = scmp.lt.u32.totalorder %s1132_s6, %s1127_s8  ;;  %p1136_p8 = scmp.lt.u32.totalorder %s1127_s8, %s1437_s13 }
  0x43   : > { %p1130_p13 = pnand %p1457_p12, %p1128_p11 }
  0x44   : > { %p1135_p7 = por %p1134_p3, %p1133_p0 }
  0x45   : > { %p1131_p2 = pneg %p1130_p13 }
  0x46   : > { %p1137_p9 = por %p1136_p8, %p1135_p7 }
  0x48   : > { %p1138_p10 = pnand %p1137_p9, %p1131_p2 }
  0x4a   : > { %1141 = shalt.err (!%p1138_p10)
}
  0x4b   : > { %s1142_s5 = scalar_lea.vmem %s1449_s14, 256  ;;  %s1300_s25 = smov [#allocation2]  }
  0x4c   : > { %p1143_p1 = scmp.ne.s32.totalorder %s1449_s14, %s1142_s5  ;;  %s1147_s12 = sshll.u32 %s1300_s25, 4  ;;  %s1148_s12 = int_to_ptr.vmem [resolvable:$false] %s1147_s12 }
  0x4d   : > { %s1149_s9 = scalar_lea.vmem %s1148_s12, 512  ;;  %p1150_p11 = scmp.lt.s32.totalorder %s1449_s14, %s1148_s12 }
  0x4e   : > { %p1145_p4 = pnand %p1143_p1, %p1457_p12  ;;  %p1151_p13 = scmp.lt.s32.totalorder %s1149_s9, %s1142_s5 }
  0x50   : > { %p1146_p5 = pneg %p1145_p4  ;;  %p1152_p0 = por %p1151_p13, %p1150_p11 }
  0x52   : > { %p1153_p3 = pnand %p1152_p0, %p1146_p5 }
  0x54   : > { %1156 = shalt.err (!%p1153_p3)
}
  0x55   : > { %1036 = dma.hbm_to_vmem [thread:$0]  (!%p1445_p6), %s1437_s13, 256, %s1449_s14, %s183_s30, %s1298_s22, %s1298_s22, %s1299_s23  }
  0x56   : > { %s757_s10 = sshll.u32 %s1409_s7, 8  ;;  %s777_s8 = sshll.u32 %s1295_s18, 12 }
  0x57   : > { %s1490_s25 = scalar_lea.hbm %s1705_s1, %s777_s8  ;;  %s207_s12 = scalar_lea.vmem [#allocation5], %s757_s10 }
  0x58   : > { %s215_s9 = sshll.u32 %s207_s12, 4  ;;  %s1730_s0 = sand.u32 1, %s1295_s18   ;;  %s1492_s9 = int_to_ptr.vmem [resolvable:$true] %s215_s9 }
  0x59   : > { %s1496_s2 = scalar_lea.sflag [#allocation6], %s1730_s0  ;;  %s1157_s24 = scalar_lea.hbm %s1490_s25, 4096 }
  0x5a   : > { %p1158_p2 = scmp.ne.s32.totalorder %s1490_s25, %s1157_s24  ;;  %s1162_s30 = scalar_lea.hbm %s1705_s1, 8192 }
  0x5b   : > { %p1163_p9 = scmp.lt.u32.totalorder %s1490_s25, %s1705_s1  ;;  %p1164_p10 = scmp.lt.u32.totalorder %s1162_s30, %s1157_s24 }
  0x5c   : > { %p1160_p7 = pnand %p1158_p2, %p1457_p12  ;;  %p1166_p4 = scmp.lt.u32.totalorder %s1157_s24, %s1490_s25 }
  0x5d   : > { %p1165_p1 = por %p1164_p10, %p1163_p9 }
  0x5e   : > { %p1161_p8 = pneg %p1160_p7 }
  0x5f   : > { %p1167_p5 = por %p1166_p4, %p1165_p1 }
  0x61   : > { %p1168_p11 = pnand %p1167_p5, %p1161_p8 }
  0x63   : > { %1171 = shalt.err (!%p1168_p11)
}
  0x64   : > { %s1172_s0 = scalar_lea.vmem %s1492_s9, 4096  ;;  %s1301_s10 = smov [#allocation5]  }
  0x65   : > { %p1173_p13 = scmp.ne.s32.totalorder %s1492_s9, %s1172_s0  ;;  %s1177_s6 = sshll.u32 %s1301_s10, 4  ;;  %s1178_s6 = int_to_ptr.vmem [resolvable:$false] %s1177_s6 }
  0x66   : > { %s1179_s12 = scalar_lea.vmem %s1178_s6, 8192  ;;  %p1180_p2 = scmp.lt.s32.totalorder %s1492_s9, %s1178_s6 }
  0x67   : > { %p1175_p0 = pnand %p1173_p13, %p1457_p12  ;;  %p1181_p7 = scmp.lt.s32.totalorder %s1179_s12, %s1172_s0 }
  0x69   : > { %p1176_p3 = pneg %p1175_p0  ;;  %p1182_p9 = por %p1181_p7, %p1180_p2 }
  0x6b   : > { %p1183_p10 = pnand %p1182_p9, %p1176_p3 }
  0x6d   : > { %1186 = shalt.err (!%p1183_p10)
}
  0x6e   : > { %1039 = dma.hbm_to_vmem [thread:$0]  (!%p1445_p6), %s1490_s25, 4096, %s1492_s9, %s1496_s2, %s1298_s22, %s1298_s22, %s1299_s23  }
  0x6f   : > { %s1731_s24 = sshll.u32 %s1295_s18, 8  ;;  %s1732_s8 = sshll.u32 %s1409_s7, 4 }
  0x70   : > { %s1528_s30 = scalar_lea.hbm %s1707_s3, %s1731_s24  ;;  %s229_s5 = scalar_lea.vmem [#allocation8], %s1732_s8 }
  0x71   : > { %s236_s0 = sshll.u32 %s229_s5, 4  ;;  %s226_s10 = scalar_lea.sflag [#allocation9], %s1409_s7  ;;  %s1532_s0 = int_to_ptr.vmem [resolvable:$true] %s236_s0 }
  0x72   : > { %s1187_s6 = scalar_lea.hbm %s1528_s30, 256  ;;  %s1192_s9 = scalar_lea.hbm %s1707_s3, 512 }
  0x73   : > { %p1188_p8 = scmp.ne.s32.totalorder %s1528_s30, %s1187_s6  ;;  %p1193_p5 = scmp.lt.u32.totalorder %s1528_s30, %s1707_s3 }
  0x74   : > { %p1194_p11 = scmp.lt.u32.totalorder %s1192_s9, %s1187_s6  ;;  %p1196_p0 = scmp.lt.u32.totalorder %s1187_s6, %s1528_s30 }
  0x75   : > { %p1190_p1 = pnand %p1188_p8, %p1457_p12 }
  0x76   : > { %p1195_p13 = por %p1194_p11, %p1193_p5 }
  0x77   : > { %p1191_p4 = pneg %p1190_p1 }
  0x78   : > { %p1197_p3 = por %p1196_p0, %p1195_p13 }
  0x7a   : > { %p1198_p2 = pnand %p1197_p3, %p1191_p4 }
  0x7c   : > { %1201 = shalt.err (!%p1198_p2)
}
  0x7d   : > { %s1202_s13 = scalar_lea.vmem %s1532_s0, 256  ;;  %s1302_s14 = smov [#allocation8]  }
  0x7e   : > { %p1203_p7 = scmp.ne.s32.totalorder %s1532_s0, %s1202_s13  ;;  %s1207_s8 = sshll.u32 %s1302_s14, 4  ;;  %s1208_s8 = int_to_ptr.vmem [resolvable:$false] %s1207_s8 }
  0x7f   : > { %s1209_s5 = scalar_lea.vmem %s1208_s8, 512  ;;  %p1210_p8 = scmp.lt.s32.totalorder %s1532_s0, %s1208_s8 }
  0x80   : > { %p1205_p9 = pnand %p1203_p7, %p1457_p12  ;;  %p1211_p1 = scmp.lt.s32.totalorder %s1209_s5, %s1202_s13 }
  0x82   : > { %p1206_p10 = pneg %p1205_p9  ;;  %p1212_p5 = por %p1211_p1, %p1210_p8 }
  0x84   : > { %p1213_p11 = pnand %p1212_p5, %p1206_p10 }
  0x86   : > { %1216 = shalt.err (!%p1213_p11)
}
  0x87   : > { %1042 = dma.hbm_to_vmem [thread:$0]  (!%p1445_p6), %s1528_s30, 256, %s1532_s0, %s226_s10, %s1298_s22, %s1298_s22, %s1299_s23  }
  0x88   : > { %p1733_p12 = scmp.ne.s32.totalorder %s1722_s29, 0 }
  0x89   : > { %s1564_s11 = sand.u32 (!%p1733_p12), 1, %s1287_s16   ;;  %p1734_p4 = scmp.ne.s32.totalorder (!%p1733_p12), %s1719_s26, 0 }
  0x8a   : > { %248 = sbr.rel (%p1733_p12) target bundleno = 979 (0x3d3), region = 36  ;;  %s1567_s6 = sshll.u32 (!%p1733_p12), %s1564_s11, 4 }
  0x8b   : > { %s251_s20 = scalar_lea.sflag (!%p1733_p12), [#allocation3], %s1564_s11  ;;  %s254_s2 = scalar_lea.vmem (!%p1733_p12), [#allocation2], %s1567_s6 }
  0x91   : > { %1262 = dma.done.wait (%p1734_p4), %s251_s20, 256  }
  0x92   : > { %1264 = vsyncadd (%p1734_p4), %s251_s20, 4294967040  ;;  %s259_s29 = sand.u32 1, %s1355_s19   ;;  %s766_s7 = sshll.u32 %s1564_s11, 8 }
  0x93   : > { %s260_s22 = scalar_lea.sflag [#allocation6], %s259_s29  ;;  %s1577_s23 = scalar_lea.vmem [#allocation5], %s766_s7 }
  0x94   : > { %1266 = dma.done.wait (%p1734_p4), %s260_s22, 4096  }
  0x95   : > { %1268 = vsyncadd (%p1734_p4), %s260_s22, 4294963200  ;;  %p1735_p6 = scmp.eq.s32.totalorder %s1355_s19, 0 }
  0x97   : > { %1270 = dma.done.wait (%p1735_p6), [#allocation6], 2048   ;;  %p1736_p13 = pmov %p1735_p6 }
  0x98   : > { %s273_s30 = scalar_lea.sflag [#allocation9], %s1564_s11  ;;  %s276_s0 = scalar_lea.vmem [#allocation8], %s1567_s6 }
  0x99   : > { %1272 = vsyncadd (%p1736_p13), [#allocation6], 4294965248 }
  0x9a   : > { %1274 = dma.done.wait (%p1734_p4), %s273_s30, 256  }
  0x9b   : > { %1276 = vsyncadd (%p1734_p4), %s273_s30, 4294967040  ;;  %v1303_v0 = vmov 0.0|0.0   ;;  %vm1304_vm0 = vmmov 0   ;;  %v1305_v1 = vmov 0.0   ;;  %v317_v2 = vld [vmem:[%s1577_s23] sm:$0xff]  ;;  %v318_v3 = vld [vmem:[%s1577_s23 + $0x8] sm:$0xff] }
  0x9c   : > { %937 = vmatprep.subr.bf16.mxu0 %v1303_v0  ;;  %961 = vmatprep.subr.bf16.mxu1 %v1303_v0  ;;  %v333_v4 = vld [vmem:[%s1577_s23 + $0x80] sm:$0xff]  ;;  %v938_v5 = vpack.c.bf16 %v318_v3, %v317_v2  ;;  %v334_v6 = vld [vmem:[%s1577_s23 + $0x88] sm:$0xff]  ;;  %v319_v8 = vld [vmem:[%s1577_s23 + $0x10] sm:$0xff]  ;;  %s310_s26 = scalar_lea.vmem [#allocation10], %s1567_s6  ;;  %s779_s25 = sshll.u32 %s1355_s19, 8 }
  0x9d   : > { %864 = vmatprep.mubr.msk.f32.mxu0 %vm1304_vm0, %v1305_v1  ;;  %899 = vmatprep.mubr.msk.f32.mxu1 %vm1304_vm0, %v1305_v1  ;;  %v962_v7 = vpack.c.bf16 %v334_v6, %v333_v4  ;;  %v320_v9 = vld [vmem:[%s1577_s23 + $0x18] sm:$0xff]  ;;  %v335_v10 = vld [vmem:[%s1577_s23 + $0x90] sm:$0xff]  ;;  %v321_v14 = vld [vmem:[%s1577_s23 + $0x20] sm:$0xff]  ;;  %s622_s10 = sshll.u32 %s310_s26, 4  ;;  %s1660_s24 = scalar_lea.hbm %s1708_s4, %s779_s25  ;;  %s1655_s10 = int_to_ptr.vmem [resolvable:$true] %s622_s10 }
  0x9e   : > { %939 = vmatpush3.bf16.xpose.msra.mxu0 %v938_v5  ;;  %v336_v11 = vld [vmem:[%s1577_s23 + $0x98] sm:$0xff]  ;;  %v941_v12 = vpack.c.bf16 %v320_v9, %v319_v8  ;;  %v322_v15 = vld [vmem:[%s1577_s23 + $0x28] sm:$0xff]  ;;  %v337_v16 = vld [vmem:[%s1577_s23 + $0xa0] sm:$0xff]  ;;  %s609_s13 = scalar_lea.sflag [#allocation4], %s1564_s11  ;;  %s1217_s14 = scalar_lea.vmem %s1655_s10, 256 }
  0x9f   : > { %963 = vmatpush3.bf16.xpose.msra.mxu1 %v962_v7  ;;  %940 = vmatprep.subr.bf16.mxu0 %v1303_v0  ;;  %v965_v13 = vpack.c.bf16 %v336_v11, %v335_v10  ;;  %v338_v17 = vld [vmem:[%s1577_s23 + $0xa8] sm:$0xff]  ;;  %v944_v18 = vpack.c.bf16 %v322_v15, %v321_v14  ;;  %v323_v20 = vld [vmem:[%s1577_s23 + $0x30] sm:$0xff]  ;;  %v324_v21 = vld [vmem:[%s1577_s23 + $0x38] sm:$0xff]  ;;  %p1218_p0 = scmp.ne.s32.totalorder %s1655_s10, %s1217_s14  ;;  %p1737_p3 = scmp.ne.s32.totalorder %s1720_s27, 0 }
  0xa0   : > { %964 = vmatprep.subr.bf16.mxu1 %v1303_v0  ;;  %v968_v19 = vpack.c.bf16 %v338_v17, %v337_v16  ;;  %v339_v22 = vld [vmem:[%s1577_s23 + $0xb0] sm:$0xff]  ;;  %v340_v23 = vld [vmem:[%s1577_s23 + $0xb8] sm:$0xff]  ;;  %v947_v24 = vpack.c.bf16 %v324_v21, %v323_v20  ;;  %v325_v26 = vld [vmem:[%s1577_s23 + $0x40] sm:$0xff]  ;;  %s1306_s19 = smov [#allocation10]  }
  0xa1   : > { %v971_v25 = vpack.c.bf16 %v340_v23, %v339_v22  ;;  %v326_v27 = vld [vmem:[%s1577_s23 + $0x48] sm:$0xff]  ;;  %v341_v28 = vld [vmem:[%s1577_s23 + $0xc0] sm:$0xff]  ;;  %v327_v32 = vld [vmem:[%s1577_s23 + $0x50] sm:$0xff]  ;;  %p1219_p2 = pnand %p1218_p0, %p1737_p3  ;;  %s1221_s8 = sshll.u32 %s1306_s19, 4  ;;  %s1222_s8 = int_to_ptr.vmem [resolvable:$false] %s1221_s8 }
  0xa2   : > { %v342_v29 = vld [vmem:[%s1577_s23 + $0xc8] sm:$0xff]  ;;  %v950_v30 = vpack.c.bf16 %v326_v27, %v325_v26  ;;  %v328_v33 = vld [vmem:[%s1577_s23 + $0x58] sm:$0xff]  ;;  %v343_v34 = vld [vmem:[%s1577_s23 + $0xd0] sm:$0xff]  ;;  %s1223_s5 = scalar_lea.vmem %s1222_s8, 512  ;;  %p1224_p9 = scmp.lt.s32.totalorder %s1655_s10, %s1222_s8 }
  0xa3   : > { %v974_v31 = vpack.c.bf16 %v342_v29, %v341_v28  ;;  %v344_v35 = vld [vmem:[%s1577_s23 + $0xd8] sm:$0xff]  ;;  %v953_v36 = vpack.c.bf16 %v328_v33, %v327_v32  ;;  %v329_v38 = vld [vmem:[%s1577_s23 + $0x60] sm:$0xff]  ;;  %v330_v39 = vld [vmem:[%s1577_s23 + $0x68] sm:$0xff]  ;;  %p1220_p7 = pneg %p1219_p2  ;;  %p1225_p10 = scmp.lt.s32.totalorder %s1223_s5, %s1217_s14 }
  0xa4   : > { %v977_v37 = vpack.c.bf16 %v344_v35, %v343_v34  ;;  %v345_v40 = vld [vmem:[%s1577_s23 + $0xe0] sm:$0xff]  ;;  %v346_v41 = vld [vmem:[%s1577_s23 + $0xe8] sm:$0xff]  ;;  %v956_v42 = vpack.c.bf16 %v330_v39, %v329_v38  ;;  %v331_v44 = vld [vmem:[%s1577_s23 + $0x70] sm:$0xff] }
  0xa5   : > { %v980_v43 = vpack.c.bf16 %v346_v41, %v345_v40  ;;  %v332_v45 = vld [vmem:[%s1577_s23 + $0x78] sm:$0xff]  ;;  %v347_v46 = vld [vmem:[%s1577_s23 + $0xf0] sm:$0xff]  ;;  %v515_v56 = vld [vmem:[#allocation7] sm:$0xff]  ;;  %p1226_p8 = por %p1225_p10, %p1224_p9 }
  0xa6   : > { %942 = vmatpush3.bf16.xpose.msra.mxu0 %v941_v12  ;;  %v348_v47 = vld [vmem:[%s1577_s23 + $0xf8] sm:$0xff]  ;;  %v959_v48 = vpack.c.bf16 %v332_v45, %v331_v44  ;;  %v315_v50 = vld [vmem:[%s254_s2] sm:$0xff]  ;;  %v516_v57 = vld [vmem:[#allocation7 + $0x8] sm:$0xff] }
  0xa7   : > { %966 = vmatpush3.bf16.xpose.msra.mxu1 %v965_v13  ;;  %943 = vmatprep.subr.bf16.mxu0 %v1303_v0  ;;  %v983_v49 = vpack.c.bf16 %v348_v47, %v347_v46  ;;  %v316_v51 = vld [vmem:[%s254_s2 + $0x8] sm:$0xff]  ;;  %v517_v58 = vld [vmem:[#allocation7 + $0x10] sm:$0xff]  ;;  %v985_v59 = vpack.c.bf16 %v516_v57, %v515_v56  ;;  %v519_v62 = vld [vmem:[#allocation7 + $0x20] sm:$0xff]  ;;  %p1227_p1 = pnand %p1226_p8, %p1220_p7 }
  0xa8   : > { %967 = vmatprep.subr.bf16.mxu1 %v1303_v0  ;;  %v518_v60 = vld [vmem:[#allocation7 + $0x18] sm:$0xff]  ;;  %v520_v63 = vld [vmem:[#allocation7 + $0x28] sm:$0xff]  ;;  %v521_v2 = vld [vmem:[#allocation7 + $0x30] sm:$0xff] }
  0xa9   : > { %v989_v61 = vpack.c.bf16 %v518_v60, %v517_v58  ;;  %v522_v3 = vld [vmem:[#allocation7 + $0x38] sm:$0xff]  ;;  %v523_v13 = vld [vmem:[#allocation7 + $0x40] sm:$0xff]  ;;  %v524_v14 = vld [vmem:[#allocation7 + $0x48] sm:$0xff] }
  0xaa   : > { %v997_v4 = vpack.c.bf16 %v522_v3, %v521_v2  ;;  %v1001_v15 = vpack.c.bf16 %v524_v14, %v523_v13  ;;  %v525_v16 = vld [vmem:[#allocation7 + $0x50] sm:$0xff]  ;;  %v526_v17 = vld [vmem:[#allocation7 + $0x58] sm:$0xff]  ;;  %v528_v20 = vld [vmem:[#allocation7 + $0x68] sm:$0xff] }
  0xab   : > { %v529_v22 = vld [vmem:[#allocation7 + $0x70] sm:$0xff]  ;;  %v530_v23 = vld [vmem:[#allocation7 + $0x78] sm:$0xff] }
  0xac   : > { %v507_v27 = vld [vmem:[%s276_s0] sm:$0xff]  ;;  %v508_v28 = vld [vmem:[%s276_s0 + $0x8] sm:$0xff] }
  0xad   : > { %vm509_vm1 = vcmp.ge.f32.partialorder %v507_v27, 0.5  ;;  %vm510_vm2 = vcmp.ge.f32.partialorder %v508_v28, 0.5 }
  0xae   : > { %945 = vmatpush3.bf16.xpose.msra.mxu0 %v944_v18  ;;  %v527_v18 = vld [vmem:[#allocation7 + $0x60] sm:$0xff]  ;;  %v512_v34 = vsel %vm510_vm2, 2.0, %v1305_v1 }
  0xaf   : > { %969 = vmatpush3.bf16.xpose.msra.mxu1 %v968_v19  ;;  %946 = vmatprep.subr.bf16.mxu0 %v1303_v0  ;;  %v1005_v19 = vpack.c.bf16 %v526_v17, %v525_v16  ;;  %v1009_v21 = vpack.c.bf16 %v528_v20, %v527_v18 }
  0xb0   : > { %970 = vmatprep.subr.bf16.mxu1 %v1303_v0 }
  0xb6   : > { %948 = vmatpush3.bf16.xpose.msra.mxu0 %v947_v24  ;;  %v1013_v24 = vpack.c.bf16 %v530_v23, %v529_v22 }
  0xb7   : > { %972 = vmatpush3.bf16.xpose.msra.mxu1 %v971_v25  ;;  %949 = vmatprep.subr.bf16.mxu0 %v1303_v0 }
  0xb8   : > { %973 = vmatprep.subr.bf16.mxu1 %v1303_v0 }
  0xbe   : > { %951 = vmatpush3.bf16.xpose.msra.mxu0 %v950_v30  ;;  %v511_v30 = vsel %vm509_vm1, 2.0, %v1305_v1 }
  0xbf   : > { %975 = vmatpush3.bf16.xpose.msra.mxu1 %v974_v31  ;;  %952 = vmatprep.subr.bf16.mxu0 %v1303_v0 }
  0xc0   : > { %976 = vmatprep.subr.bf16.mxu1 %v1303_v0 }
  0xc6   : > { %954 = vmatpush3.bf16.xpose.msra.mxu0 %v953_v36 }
  0xc7   : > { %978 = vmatpush3.bf16.xpose.msra.mxu1 %v977_v37  ;;  %955 = vmatprep.subr.bf16.mxu0 %v1303_v0 }
  0xc8   : > { %979 = vmatprep.subr.bf16.mxu1 %v1303_v0 }
  0xce   : > { %957 = vmatpush3.bf16.xpose.msra.mxu0 %v956_v42 }
  0xcf   : > { %981 = vmatpush3.bf16.xpose.msra.mxu1 %v980_v43  ;;  %958 = vmatprep.subr.bf16.mxu0 %v1303_v0 }
  0xd0   : > { %982 = vmatprep.subr.bf16.mxu1 %v1303_v0  ;;  %v993_v0 = vpack.c.bf16 %v520_v63, %v519_v62 }
  0xd6   : > { %960 = vmatpush3.bf16.xpose.msra.mxu0 %v959_v48 }
  0xd7   : > { %984 = vmatpush3.bf16.xpose.msra.mxu1 %v983_v49  ;;  %986 = vmatprep.subr.bf16.mxu0 %v985_v59 }
  0xdd   : > { %865 = vmatmul.mubr.f32.vlgmr.msra.gmra.mrb[0].mxu0 %v315_v50 }
  0xde   : > { %900 = vmatmul.mubr.f32.vlgmr.msra.gmra.mrb[0].mxu1 %v316_v51  ;;  %988 = vmatpush3.bf16.msra.mxu0 %v985_v59 }
  0xdf   : > { %990 = vmatprep.subr.bf16.mxu0 %v989_v61 }
  0xe2   : > { %992 = vmatpush3.bf16.msra.mxu0 %v989_v61 }
  0xe3   : > { %994 = vmatprep.subr.bf16.mxu0 %v993_v0 }
  0xe6   : > { %996 = vmatpush3.bf16.msra.mxu0 %v993_v0 }
  0xe7   : > { %998 = vmatprep.subr.bf16.mxu0 %v997_v4 }
  0xea   : > { %1000 = vmatpush3.bf16.msra.mxu0 %v997_v4 }
  0xeb   : > { %1002 = vmatprep.subr.bf16.mxu0 %v1001_v15 }
  0xee   : > { %1004 = vmatpush3.bf16.msra.mxu0 %v1001_v15 }
  0xef   : > { %1006 = vmatprep.subr.bf16.mxu0 %v1005_v19 }
  0xf2   : > { %1008 = vmatpush3.bf16.msra.mxu0 %v1005_v19 }
  0xf3   : > { %1010 = vmatprep.subr.bf16.mxu0 %v1009_v21 }
  0xf6   : > { %1012 = vmatpush3.bf16.msra.mxu0 %v1009_v21 }
  0xf7   : > { %1014 = vmatprep.subr.bf16.mxu0 %v1013_v24 }
  0xfa   : > { %1016 = vmatpush3.bf16.msra.mxu0 %v1013_v24 }
 0x1b0   : > { %v415_v52 = vpop.f32.mrb[0].mxu0 }
 0x1b1   : > { %489 = vmax.xlane.f32.xlu0 %v415_v52  ;;  %v866_v53 = vpop.f32.mrb[1].mxu0  ;;  %v485_v54 = vpop.f32.mrb[0].mxu1 }
 0x1b2   : > { %v901_v55 = vpop.f32.mrb[1].mxu1 }
 0x1b5   : > { %491 = vmax.xlane.f32.xlu0 %v485_v54 }
 0x23e   : > { %v490_v5 = vpop.xlane.xlu0 %489 }
 0x23f   : > { %v493_v6 = vsub.f32 %v415_v52, %v490_v5 }
 0x241   : > { %v495_v7 = vmul.f32 1.442695, %v493_v6 }
 0x242   : > { %v492_v8 = vpop.xlane.xlu0 %491 }
 0x243   : > { %1091 = vpow2.f32 %v495_v7  ;;  %v494_v9 = vsub.f32 %v485_v54, %v492_v8 }
 0x245   : > { %v497_v10 = vmul.f32 1.442695, %v494_v9 }
 0x247   : > { %1093 = vpow2.f32 %v497_v10 }
 0x24d   : > { %v1092_v11 = vpop.eup %1091 }
 0x24e   : > { %499 = vadd.xlane.f32.xlu1 %v1092_v11 }
 0x251   : > { %v1094_v12 = vpop.eup %1093 }
 0x252   : > { %501 = vadd.xlane.f32.xlu1 %v1094_v12 }
 0x2db   : > { %v500_v25 = vpop.xlane.xlu1 %499 }
 0x2dc   : > { %1095 = vrcp.f32 %v500_v25 }
 0x2df   : > { %v502_v26 = vpop.xlane.xlu1 %501 }
 0x2e0   : > { %1097 = vrcp.f32 %v502_v26 }
 0x2e6   : > { %v1096_v29 = vpop.eup %1095 }
 0x2e7   : > { %v505_v31 = vmul.f32 %v1096_v29, %v1092_v11 }
 0x2e9   : > { %v513_v32 = vmul.f32 %v511_v30, %v505_v31 }
 0x2ea   : > { %v1098_v33 = vpop.eup %1097 }
 0x2eb   : > { %934 = vmatprep.mubr.f32.mxu0 %v513_v32  ;;  %v506_v35 = vmul.f32 %v1098_v33, %v1094_v12 }
 0x2ed   : > { %v514_v36 = vmul.f32 %v512_v34, %v506_v35 }
 0x2ef   : > { %935 = vmatmul.mubr.f32.vlgmr.msra.gmra.mrb[2].mxu0 %v514_v36 }
 0x3c2   : > { %v936_v37 = vpop.f32.mrb[2].mxu0 }
 0x3c3   : > { %607 = vst [vmem:[%s310_s26 + $0x8] sm:$0xff] %v936_v37  ;;  %v597_v1 = vpop.f32.mrb[3].mxu0 }
 0x3c4   : > { %606 = vst [vmem:[%s310_s26] sm:$0xff] %v597_v1 }
 0x3c5   : > { %1230 = shalt.err (!%p1227_p1)
}
 0x3c6   : > { %s1231_s6 = scalar_lea.hbm %s1660_s24, 256  ;;  %s1235_s29 = scalar_lea.hbm %s1708_s4, 512 }
 0x3c7   : > { %p1232_p5 = scmp.ne.s32.totalorder %s1660_s24, %s1231_s6  ;;  %p1236_p4 = scmp.lt.u32.totalorder %s1660_s24, %s1708_s4 }
 0x3c8   : > { %p1237_p6 = scmp.lt.u32.totalorder %s1235_s29, %s1231_s6  ;;  %p1239_p0 = scmp.lt.u32.totalorder %s1231_s6, %s1660_s24 }
 0x3c9   : > { %p1233_p11 = pnand %p1232_p5, %p1737_p3 }
 0x3ca   : > { %p1238_p13 = por %p1237_p6, %p1236_p4 }
 0x3cb   : > { %p1234_p12 = pneg %p1233_p11 }
 0x3cc   : > { %p1240_p2 = por %p1239_p0, %p1238_p13 }
 0x3ce   : > { %p1241_p7 = pnand %p1240_p2, %p1234_p12 }
 0x3d0   : > { %1244 = shalt.err (!%p1241_p7)
}
 0x3d1   : > { %s1307_s23 = smov 128   ;;  %s1308_s30 = smov 8  }
 0x3d2   : > { %1027 = dma.vmem_to_hbm [thread:$0]  (%p1737_p3), %s1655_s10, 256, %s1660_s24, %s609_s13, %s1307_s23, %s1307_s23, %s1308_s30  }
 0x3d3 PF: > { %s637_s0 = sand.u32 1, %s1283_s15   ;;  %p1738_p9 = scmp.ne.s32.totalorder %s1721_s28, 0 }
 0x3d4   : > { %p1739_p10 = scmp.ge.s32.totalorder %s1295_s18, 2  ;;  %s638_s26 = scalar_lea.sflag [#allocation4], %s637_s0 }
 0x3d6   : > { %p1044_p8 = pnand %p1739_p10, %p1738_p9 }
 0x3d8   : > { %1278 = dma.done.wait (!%p1044_p8), %s638_s26, 256  }
 0x3d9   : > { %1280 = vsyncadd (!%p1044_p8), %s638_s26, 4294967040  ;;  %s1740_s25 = sld [smem:[#allocation16_spill]]  ;;  %p23_p1 = scmp.ge.s32.totalorder %s1359_s21, 4  }
 0x3da   : > { %s1741_s15 = smov %s1287_s16  ;;  %s1742_s16 = smov %s1291_s17 }
 0x3db   : > { %s1744_s18 = smov %s1359_s21  ;;  %25 = sbr.rel (!%p23_p1) target bundleno = 12 (0xc), region = 111 }
 0x3df   : > { %s1743_s17 = smov %s1740_s25 }
 0x3e2   :  { %643 = vsyncpa [#allocation3], 1 }
 0x3e3   :  { %645 = vsyncpa [#allocation3 + $0x1], 1 }
 0x3e4   :  { %646 = vsyncpa [#allocation6], 1 }
 0x3e5   :  { %648 = vsyncpa [#allocation6 + $0x1], 1 }
 0x3e6   :  { %649 = vsyncpa [#allocation9], 1 }
 0x3e7   :  { %651 = vsyncpa [#allocation9 + $0x1], 1 }
 0x3e8   :  { %652 = vsyncpa [#allocation4], 1 }
 0x3e9   :  { %654 = vsyncpa [#allocation4 + $0x1], 1 }

</bundles_post_ra>
